<compile_context>
chip_gen: v7x
topology: tpu7x:2x2x1
jax: 0.10.0
libtpu: 0.0.40
codegen_flags: <defaults>
</compile_context>

<pallas_src>
import jax
import jax.numpy as jnp
from jax import lax
from jax.experimental import pallas as pl
from jax.experimental.pallas import tpu as pltpu

EPS = 1e-3  # matches BatchNorm2d(eps=0.001) in the PyTorch module


def conv1x1_bn_kernel(x_ref, w_ref, gb_ref, o_ref):
    # x_ref : (M, Cin)    bf16  -- NHWC-flattened input (lane axis = Cin)
    # w_ref : (Cout, Cin) bf16  -- PyTorch conv weight, used untransposed
    # gb_ref: (2, Cout)   f32   -- row 0 = gamma, row 1 = beta
    # o_ref : (M, Cout)         -- lane-dense output (full 128 lanes)

    # "NT" contraction (lhs dim 1 x rhs dim 1) -> (M, Cout), f32 accumulate.
    y = lax.dot_general(
        x_ref[...], w_ref[...],
        dimension_numbers=(((1,), (1,)), ((), ())),
        preferred_element_type=jnp.float32,
    )  # (M, Cout) f32

    # BatchNorm2d training-mode batch statistics per output channel, reduced
    # over the N*H*W positions (sublane axis here).  Two-pass variance.
    inv_m = jnp.float32(1.0 / y.shape[0])
    mean = jnp.sum(y, axis=0, keepdims=True) * inv_m                  # (1, Cout)
    centered = y - mean
    var = jnp.sum(centered * centered, axis=0, keepdims=True) * inv_m  # (1, Cout)

    gamma = gb_ref[0:1, :]                                            # (1, Cout)
    beta = gb_ref[1:2, :]                                             # (1, Cout)

    scale = gamma * lax.rsqrt(var + EPS)                              # (1, Cout)
    o_ref[...] = (centered * scale + beta).astype(o_ref.dtype)


def conv1x1_bn(x_nchw, weight, gamma, beta, *, compute_dtype=jnp.bfloat16):
    """x_nchw: (N, Cin, H, W); weight: (Cout, Cin); gamma/beta: (Cout,)."""
    N, Cin, H, W = x_nchw.shape
    Cout = weight.shape[0]
    M = N * H * W

    # NHWC flattening -> (M, Cin): lane-dense along Cin.  This small
    # transpose (~80-160 KB) fuses with the bf16 cast in XLA; in a real
    # pipeline the producer layer / param store would hand us this layout
    # and dtype directly.
    x_mk = jnp.transpose(x_nchw, (0, 2, 3, 1)).reshape(M, Cin).astype(compute_dtype)
    w = weight.astype(compute_dtype)                                  # (Cout, Cin)
    gb = jnp.stack([gamma, beta], axis=0).astype(jnp.float32)         # (2, Cout)

    out_itemsize = jnp.dtype(x_nchw.dtype).itemsize
    bytes_accessed = (
        x_mk.size * jnp.dtype(compute_dtype).itemsize
        + w.size * jnp.dtype(compute_dtype).itemsize
        + gb.size * 4
        + M * Cout * out_itemsize
    )

    out_mc = pl.pallas_call(
        conv1x1_bn_kernel,
        out_shape=jax.ShapeDtypeStruct((M, Cout), x_nchw.dtype),
        in_specs=[
            pl.BlockSpec(memory_space=pltpu.MemorySpace.VMEM),
            pl.BlockSpec(memory_space=pltpu.MemorySpace.VMEM),
            pl.BlockSpec(memory_space=pltpu.MemorySpace.VMEM),
        ],
        out_specs=pl.BlockSpec(memory_space=pltpu.MemorySpace.VMEM),
        cost_estimate=pl.CostEstimate(
            flops=2 * M * Cout * Cin,
            transcendentals=Cout,
            bytes_accessed=bytes_accessed,
        ),
    )(x_mk, w, gb)

    # (M, Cout) -> (N, Cout, H, W): a ~25 KB transpose, trivial.
    return jnp.transpose(out_mc.reshape(N, H, W, Cout), (0, 3, 1, 2))


def reference(x_nchw, weight, gamma, beta):
    # Pure-JAX reference (training-mode BN, biased variance), f32 math.
    y = jnp.einsum("nchw,oc->nohw", x_nchw, weight)
    mean = jnp.mean(y, axis=(0, 2, 3), keepdims=True)
    var = jnp.mean((y - mean) ** 2, axis=(0, 2, 3), keepdims=True)
    y_hat = (y - mean) / jnp.sqrt(var + EPS)
    return y_hat * gamma.reshape(1, -1, 1, 1) + beta.reshape(1, -1, 1, 1)


if __name__ == "__main__":
    key = jax.random.PRNGKey(0)
    k_x, k_w, k_g, k_b = jax.random.split(key, 4)

    # Shapes implied by the module: Conv2d(832 -> 128, 1x1), input [1, 832, 7, 7].
    N, Cin, H, W, Cout = 1, 832, 7, 7, 128
    x = jax.random.normal(k_x, (N, Cin, H, W), dtype=jnp.float32)
    weight = jax.random.normal(k_w, (Cout, Cin), dtype=jnp.float32) * 0.02
    gamma = 1.0 + 0.1 * jax.random.normal(k_g, (Cout,), dtype=jnp.float32)
    beta = 0.1 * jax.random.normal(k_b, (Cout,), dtype=jnp.float32)

    out = jax.block_until_ready(conv1x1_bn(x, weight, gamma, beta))
    assert out.shape == (N, Cout, H, W)

    # (1) Tight check at matched operand precision: reference uses the same
    #     bf16-quantized operands but full f32 math -> isolates kernel math.
    ref_bf16_ops = reference(
        x.astype(jnp.bfloat16).astype(jnp.float32),
        weight.astype(jnp.bfloat16).astype(jnp.float32),
        gamma, beta,
    )
    assert jnp.allclose(out, ref_bf16_ops, atol=1e-3, rtol=1e-3)

    # (2) Sanity check against the full-f32 module semantics (tolerance sized
    #     for the bf16 operand feed recommended by the perf review).
    ref_f32 = reference(x, weight, gamma, beta)
    assert jnp.allclose(out, ref_f32, atol=3e-2, rtol=3e-2)

    print("KERNEL_OK")
</pallas_src>

<mosaic_0001>
module attributes {stable_mosaic.version = 11 : i64} {
  func.func @conv1x1_bn_kernel(%arg0: memref<49x832xbf16, #tpu.memory_space<vmem>>, %arg1: memref<128x832xbf16, #tpu.memory_space<vmem>>, %arg2: memref<2x128xf32, #tpu.memory_space<vmem>>, %arg3: memref<49x128xf32, #tpu.memory_space<vmem>>) attributes {dimension_semantics = [], scalar_prefetch = 0 : i64, scratch_operands = 0 : i64, tpu.core_type = #tpu.core_type<tc>} {
    %c0 = arith.constant 0 : index
    %c0_0 = arith.constant 0 : index
    %0 = vector.load %arg0[%c0, %c0_0] : memref<49x832xbf16, #tpu.memory_space<vmem>>, vector<49x832xbf16>
    %c0_1 = arith.constant 0 : index
    %c0_2 = arith.constant 0 : index
    %1 = vector.load %arg1[%c0_1, %c0_2] : memref<128x832xbf16, #tpu.memory_space<vmem>>, vector<128x832xbf16>
    %cst = arith.constant dense<0.000000e+00> : vector<49x128xf32>
    %2 = tpu.matmul %0, %1, %cst {dimension_numbers = #tpu.dot_dimension_numbers<[1], [1], [0], [0], [0, 0, 1, 0], [], []>} : vector<49x832xbf16>, vector<128x832xbf16>, vector<49x128xf32> -> vector<49x128xf32>
    %cst_3 = arith.constant dense<0.000000e+00> : vector<128xf32>
    %3 = vector.multi_reduction <add>, %2, %cst_3 [0] : vector<49x128xf32> to vector<128xf32>
    %4 = vector.shape_cast %3 : vector<128xf32> to vector<1x128xf32>
    %cst_4 = arith.constant 0.0204081628 : f32
    %5 = vector.broadcast %cst_4 : f32 to vector<1x128xf32>
    %6 = arith.mulf %4, %5 : vector<1x128xf32>
    %7 = vector.broadcast %6 : vector<1x128xf32> to vector<49x128xf32>
    %8 = arith.subf %2, %7 : vector<49x128xf32>
    %9 = arith.mulf %8, %8 : vector<49x128xf32>
    %cst_5 = arith.constant dense<0.000000e+00> : vector<128xf32>
    %10 = vector.multi_reduction <add>, %9, %cst_5 [0] : vector<49x128xf32> to vector<128xf32>
    %11 = vector.shape_cast %10 : vector<128xf32> to vector<1x128xf32>
    %cst_6 = arith.constant 0.0204081628 : f32
    %12 = vector.broadcast %cst_6 : f32 to vector<1x128xf32>
    %13 = arith.mulf %11, %12 : vector<1x128xf32>
    %c0_7 = arith.constant 0 : index
    %c0_8 = arith.constant 0 : index
    %14 = vector.load %arg2[%c0_7, %c0_8] : memref<2x128xf32, #tpu.memory_space<vmem>>, vector<1x128xf32>
    %c1 = arith.constant 1 : index
    %c0_9 = arith.constant 0 : index
    %15 = vector.load %arg2[%c1, %c0_9] : memref<2x128xf32, #tpu.memory_space<vmem>>, vector<1x128xf32>
    %cst_10 = arith.constant 1.000000e-03 : f32
    %16 = vector.broadcast %cst_10 : f32 to vector<1x128xf32>
    %17 = arith.addf %13, %16 : vector<1x128xf32>
    %18 = math.rsqrt %17 : vector<1x128xf32>
    %19 = arith.mulf %14, %18 : vector<1x128xf32>
    %20 = vector.broadcast %19 : vector<1x128xf32> to vector<49x128xf32>
    %21 = arith.mulf %8, %20 : vector<49x128xf32>
    %22 = vector.broadcast %15 : vector<1x128xf32> to vector<49x128xf32>
    %23 = arith.addf %21, %22 : vector<49x128xf32>
    %c0_11 = arith.constant 0 : index
    %c0_12 = arith.constant 0 : index
    %24 = vector.load %arg3[%c0_11, %c0_12] : memref<49x128xf32, #tpu.memory_space<vmem>>, vector<49x128xf32>
    tpu.vector_store %arg3[%c0_11, %c0_12], %23 {strides = array<i32>} : memref<49x128xf32, #tpu.memory_space<vmem>>, vector<49x128xf32>,
    return
  }
}

</mosaic_0001>

<bundles_post_ra>
// kernel: tpu_custom_call.1
= control target key start
LH: loop header
LB: loop body
LE: loop exit
PB: predicated region body
PF: predicated region fallthrough
CT: control target
= control target key end

     0   :  { %s1506_s0 = inlined_call_operand.vmem [shape: bf16[49,832], index: 0, kind: input, shape index: {}]   ;;  %s1507_s1 = inlined_call_operand.vmem [shape: bf16[128,832], index: 1, kind: input, shape index: {}]   ;;  %s1508_s2 = inlined_call_operand.vmem [shape: f32[2,128], index: 2, kind: input, shape index: {}]   ;;  %s1509_s3 = inlined_call_operand.hbm [shape: f32[49,128], index: 3, kind: output, shape index: {}]  }
   0x1   :  { %v1057_v0 = vld [vmem:[%s1507_s1 + $0xc] ss:$28 sps:$4 sm:$0xff]   ;;  %v1059_v1 = vld [vmem:[%s1507_s1 + $0x4] ss:$28 sps:$4 sm:$0xff]   ;;  %v1065_v5 = vld [vmem:[%s1507_s1 + $0x3c] ss:$28 sps:$4 sm:$0xff]  }
   0x2   :  { %618 = vmatprep.subr.bf16.mxu0 %v1057_v0  ;;  %v1061_v2 = vld [vmem:[%s1507_s1 + $0x8] ss:$28 sps:$4 sm:$0xff]   ;;  %v1062_v3 = vld [vmem:[%s1507_s1] ss:$28 sps:$4 sm:$0xff]   ;;  %554 = vmatprep.subr.bf16.mxu1 %v1059_v1  ;;  %v1068_v7 = vld [vmem:[%s1507_s1 + $0x38] ss:$28 sps:$4 sm:$0xff]  }
   0x3   :  { %v1063_v4 = vld [vmem:[%s1507_s1 + $0x44] ss:$28 sps:$4 sm:$0xff]   ;;  %619 = vmatpush1.bf16.xpose.msra.mxu0 %v1061_v2  ;;  %555 = vmatpush1.bf16.xpose.msra.mxu1 %v1062_v3  ;;  %v1069_v8 = vld [vmem:[%s1507_s1 + $0x7c] ss:$28 sps:$4 sm:$0xff]   ;;  %v1071_v9 = vld [vmem:[%s1507_s1 + $0x74] ss:$28 sps:$4 sm:$0xff]  }
   0x4   :  { %620 = vmatprep.subr.bf16.mxu0 %v1063_v4  ;;  %556 = vmatprep.subr.bf16.mxu1 %v1065_v5  ;;  %v1067_v6 = vld [vmem:[%s1507_s1 + $0x40] ss:$28 sps:$4 sm:$0xff]   ;;  %v1073_v10 = vld [vmem:[%s1507_s1 + $0x78] ss:$28 sps:$4 sm:$0xff]   ;;  %v1074_v11 = vld [vmem:[%s1507_s1 + $0x70] ss:$28 sps:$4 sm:$0xff]  }
   0x5   :  { %v1075_v12 = vld [vmem:[%s1507_s1 + $0xb4] ss:$28 sps:$4 sm:$0xff]   ;;  %v1077_v13 = vld [vmem:[%s1507_s1 + $0xac] ss:$28 sps:$4 sm:$0xff]   ;;  %v1083_v18 = vld [vmem:[%s1507_s1 + $0xe4] ss:$28 sps:$4 sm:$0xff]  }
   0x6   :  { %v1079_v14 = vld [vmem:[%s1507_s1 + $0xb0] ss:$28 sps:$4 sm:$0xff]   ;;  %v1080_v16 = vld [vmem:[%s1507_s1 + $0xa8] ss:$28 sps:$4 sm:$0xff]   ;;  %v1086_v21 = vld [vmem:[%s1507_s1 + $0xe0] ss:$28 sps:$4 sm:$0xff]  }
   0x7   :  { %v1107_v15 = vld [vmem:[%s1506_s0 + $0xc] ss:$28 sps:$4 sm:$0xff]   ;;  %v1113_v19 = vld [vmem:[%s1506_s0 + $0x4] ss:$28 sps:$4 sm:$0xff]   ;;  %v1089_v23 = vld [vmem:[%s1507_s1 + $0x11c] ss:$28 sps:$4 sm:$0xff]  }
   0x8   :  { %v1081_v17 = vld [vmem:[%s1507_s1 + $0xec] ss:$28 sps:$4 sm:$0xff]   ;;  %650 = vmatprep.mubr.bf16.mxu0 %v1107_v15  ;;  %586 = vmatprep.mubr.bf16.mxu1 %v1113_v19  ;;  %v1087_v22 = vld [vmem:[%s1507_s1 + $0x124] ss:$28 sps:$4 sm:$0xff]   ;;  %v1092_v25 = vld [vmem:[%s1507_s1 + $0x118] ss:$28 sps:$4 sm:$0xff]  }
   0x9   :  { %v1085_v20 = vld [vmem:[%s1507_s1 + $0xe8] ss:$28 sps:$4 sm:$0xff]   ;;  %v1091_v24 = vld [vmem:[%s1507_s1 + $0x120] ss:$28 sps:$4 sm:$0xff]   ;;  %v1095_v27 = vld [vmem:[%s1507_s1 + $0x154] ss:$28 sps:$4 sm:$0xff]  }
   0xa   :  { %v1093_v26 = vld [vmem:[%s1507_s1 + $0x15c] ss:$28 sps:$4 sm:$0xff]   ;;  %v1098_v29 = vld [vmem:[%s1507_s1 + $0x150] ss:$28 sps:$4 sm:$0xff]   ;;  %v1104_v33 = vld [vmem:[%s1507_s1 + $0x188] ss:$28 sps:$4 sm:$0xff]  }
   0xb   :  { %621 = vmatpush1.bf16.xpose.msra.mxu0 %v1067_v6  ;;  %557 = vmatpush1.bf16.xpose.msra.mxu1 %v1068_v7  ;;  %v1097_v28 = vld [vmem:[%s1507_s1 + $0x158] ss:$28 sps:$4 sm:$0xff]   ;;  %v1101_v31 = vld [vmem:[%s1507_s1 + $0x18c] ss:$28 sps:$4 sm:$0xff]  }
   0xc   :  { %622 = vmatprep.subr.bf16.mxu0 %v1069_v8  ;;  %558 = vmatprep.subr.bf16.mxu1 %v1071_v9  ;;  %v1099_v30 = vld [vmem:[%s1507_s1 + $0x194] ss:$28 sps:$4 sm:$0xff]  }
   0xd   :  { %v1103_v32 = vld [vmem:[%s1507_s1 + $0x190] ss:$28 sps:$4 sm:$0xff]   ;;  %v1114_v35 = vld [vmem:[%s1507_s1 + $0x18] ss:$28 sps:$4 sm:$0xff]  }
   0xe   :  { %v1110_v34 = vld [vmem:[%s1507_s1 + $0x14] ss:$28 sps:$4 sm:$0xff]  }
  0x13   :  { %623 = vmatpush1.bf16.xpose.msra.mxu0 %v1073_v10  ;;  %559 = vmatpush1.bf16.xpose.msra.mxu1 %v1074_v11 }
  0x14   :  { %624 = vmatprep.subr.bf16.mxu0 %v1075_v12  ;;  %560 = vmatprep.subr.bf16.mxu1 %v1077_v13 }
  0x1b   :  { %625 = vmatpush1.bf16.xpose.msra.mxu0 %v1079_v14  ;;  %561 = vmatpush1.bf16.xpose.msra.mxu1 %v1080_v16 }
  0x1c   :  { %626 = vmatprep.subr.bf16.mxu0 %v1081_v17  ;;  %562 = vmatprep.subr.bf16.mxu1 %v1083_v18 }
  0x23   :  { %627 = vmatpush1.bf16.xpose.msra.mxu0 %v1085_v20  ;;  %563 = vmatpush1.bf16.xpose.msra.mxu1 %v1086_v21 }
  0x24   :  { %628 = vmatprep.subr.bf16.mxu0 %v1087_v22  ;;  %564 = vmatprep.subr.bf16.mxu1 %v1089_v23 }
  0x2b   :  { %629 = vmatpush1.bf16.xpose.msra.mxu0 %v1091_v24  ;;  %565 = vmatpush1.bf16.xpose.msra.mxu1 %v1092_v25 }
  0x2c   :  { %630 = vmatprep.subr.bf16.mxu0 %v1093_v26  ;;  %566 = vmatprep.subr.bf16.mxu1 %v1095_v27 }
  0x33   :  { %631 = vmatpush1.bf16.xpose.msra.mxu0 %v1097_v28  ;;  %567 = vmatpush1.bf16.xpose.msra.mxu1 %v1098_v29 }
  0x34   :  { %632 = vmatprep.subr.bf16.mxu0 %v1099_v30  ;;  %568 = vmatprep.subr.bf16.mxu1 %v1101_v31 }
  0x35   :  { %8 = vsyncpa [#allocation3], 0  ;;  %vm517_vm0 = vcmask 523264   ;;  %v1105_v36 = vld [vmem:[%s1506_s0 + $0x8] ss:$28 sps:$4 sm:$0xff]   ;;  %vm815_vm1 = vcmask 1040384  }
  0x36   :  { %v1111_v37 = vld [vmem:[%s1506_s0] ss:$28 sps:$4 sm:$0xff]   ;;  %v1108_v38 = vld [vmem:[%s1507_s1 + $0x10] ss:$28 sps:$4 sm:$0xff]   ;;  %v531_v39 = vsel %vm517_vm0, %v1114_v35, 0  ;;  %s1200_s14 = smov [#allocation2]  }
  0x37   :  { %v1117_v40 = vld [vmem:[%s1507_s1 + $0x4c] ss:$28 sps:$4 sm:$0xff]   ;;  %v1131_v42 = vld [vmem:[%s1506_s0 + $0x44] ss:$28 sps:$4 sm:$0xff]   ;;  %v1134_v43 = vld [vmem:[%s1506_s0 + $0x3c] ss:$28 sps:$4 sm:$0xff]  }
  0x38   :  { %v1118_v41 = vld [vmem:[%s1507_s1 + $0x50] ss:$28 sps:$4 sm:$0xff]   ;;  %v1133_v44 = vld [vmem:[%s1506_s0 + $0x40] ss:$28 sps:$4 sm:$0xff]   ;;  %v1136_v45 = vld [vmem:[%s1506_s0 + $0x38] ss:$28 sps:$4 sm:$0xff]  }
  0x39   :  { %v1115_v46 = vld [vmem:[%s1507_s1 + $0x48] ss:$28 sps:$4 sm:$0xff]   ;;  %v534_v47 = vsel %vm517_vm0, %v1118_v41, 0  ;;  %v1141_v50 = vld [vmem:[%s1506_s0 + $0x7c] ss:$28 sps:$4 sm:$0xff]   ;;  %s892_s15 = sshll.u32 %s1200_s14, 4  ;;  %s893_s15 = int_to_ptr.vmem [resolvable:$true] %s892_s15 }
  0x3a   :  { %v1121_v48 = vld [vmem:[%s1507_s1 + $0x84] ss:$28 sps:$4 sm:$0xff]   ;;  %v1144_v51 = vld [vmem:[%s1506_s0 + $0x74] ss:$28 sps:$4 sm:$0xff]   ;;  %v40_v55 = vld [vmem:[%s1506_s0 + $0xa8] sm:$0x11]  ;;  %p1181_p1 = scmp.lt.s32.totalorder %s893_s15, %s893_s15 }
  0x3b   :  { %633 = vmatpush1.bf16.xpose.msra.mxu0 %v1103_v32  ;;  %569 = vmatpush1.bf16.xpose.msra.mxu1 %v1104_v33  ;;  %v1122_v49 = vld [vmem:[%s1507_s1 + $0x88] ss:$28 sps:$4 sm:$0xff]   ;;  %v1143_v52 = vld [vmem:[%s1506_s0 + $0x78] ss:$28 sps:$4 sm:$0xff]   ;;  %v1146_v53 = vld [vmem:[%s1506_s0 + $0x70] ss:$28 sps:$4 sm:$0xff]   ;;  %v925_v61 = vcombine.high %v40_v55, %v40_v55  ;;  %v924_v63 = vcombine.low %v40_v55, %v40_v55 }
  0x3c   :  { %682 = vmatprep.subr.bf16.mxu0 %v1110_v34  ;;  %1046 = vmatprep.subr.msk.bf16.mxu1 %vm517_vm0, %v1114_v35  ;;  %v41_v54 = vld [vmem:[%s1506_s0 + $0xb0] sm:$0x11]  ;;  %v1119_v56 = vld [vmem:[%s1507_s1 + $0x80] ss:$28 sps:$4 sm:$0xff]   ;;  %v537_v57 = vsel %vm517_vm0, %v1122_v49, 0 }
  0x3d   :  { %v1125_v58 = vld [vmem:[%s1507_s1 + $0xbc] ss:$28 sps:$4 sm:$0xff]   ;;  %v927_v60 = vcombine.high %v41_v54, %v41_v54  ;;  %v926_v62 = vcombine.low %v41_v54, %v41_v54  ;;  %v1129_v2 = vld [vmem:[%s1507_s1 + $0xf4] ss:$28 sps:$4 sm:$0xff]   ;;  %v1139_v8 = vld [vmem:[%s1507_s1 + $0x12c] ss:$28 sps:$4 sm:$0xff]  }
  0x3e   :  { %v1126_v59 = vld [vmem:[%s1507_s1 + $0xc0] ss:$28 sps:$4 sm:$0xff]   ;;  %v1123_v0 = vld [vmem:[%s1507_s1 + $0xb8] ss:$28 sps:$4 sm:$0xff]   ;;  %v1127_v6 = vld [vmem:[%s1507_s1 + $0xf0] ss:$28 sps:$4 sm:$0xff]  }
  0x3f   :  { %v540_v1 = vsel %vm517_vm0, %v1126_v59, 0  ;;  %v1130_v3 = vld [vmem:[%s1507_s1 + $0xf8] ss:$28 sps:$4 sm:$0xff]   ;;  %v1140_v9 = vld [vmem:[%s1507_s1 + $0x130] ss:$28 sps:$4 sm:$0xff]  }
  0x40   :  { %v1161_v4 = vld [vmem:[%s1506_s0 + $0x14] ss:$28 sps:$4 sm:$0xff]   ;;  %v543_v7 = vsel %vm517_vm0, %v1130_v3, 0  ;;  %v1137_v10 = vld [vmem:[%s1507_s1 + $0x128] ss:$28 sps:$4 sm:$0xff]   ;;  %v546_v11 = vsel %vm517_vm0, %v1140_v9, 0 }
  0x41   :  { %v1162_v5 = vld [vmem:[%s1506_s0 + $0x18] ss:$28 sps:$4 sm:$0xff]   ;;  %v1149_v12 = vld [vmem:[%s1507_s1 + $0x164] ss:$28 sps:$4 sm:$0xff]   ;;  %v1159_v20 = vld [vmem:[%s1506_s0 + $0x10] ss:$28 sps:$4 sm:$0xff]  }
  0x42   :  { %651 = vmatmul.mubr.bf16.vlgmr.msra.gmra.mrb[0].mxu0 %v1105_v36  ;;  %587 = vmatmul.mubr.bf16.vlgmr.msra.gmra.mrb[0].mxu1 %v1111_v37  ;;  %v1150_v13 = vld [vmem:[%s1507_s1 + $0x168] ss:$28 sps:$4 sm:$0xff]   ;;  %v1147_v14 = vld [vmem:[%s1507_s1 + $0x160] ss:$28 sps:$4 sm:$0xff]   ;;  %v1155_v18 = vld [vmem:[%s1507_s1 + $0x198] ss:$28 sps:$4 sm:$0xff]  }
  0x43   :  { %683 = vmatpush1.bf16.xpose.msra.mxu0 %v1108_v38  ;;  %1005 = vmatpush3.bf16.xpose.msra.mxu1 %v531_v39  ;;  %v549_v15 = vsel %vm517_vm0, %v1150_v13, 0  ;;  %v1157_v16 = vld [vmem:[%s1507_s1 + $0x19c] ss:$28 sps:$4 sm:$0xff]   ;;  %v1163_v21 = vld [vmem:[%s1506_s0 + $0x50] ss:$28 sps:$4 sm:$0xff]  }
  0x44   :  { %684 = vmatprep.subr.bf16.mxu0 %v1117_v40  ;;  %1047 = vmatprep.subr.msk.bf16.mxu1 %vm517_vm0, %v1118_v41  ;;  %v1158_v17 = vld [vmem:[%s1507_s1 + $0x1a0] ss:$28 sps:$4 sm:$0xff]   ;;  %v1164_v22 = vld [vmem:[%s1506_s0 + $0x4c] ss:$28 sps:$4 sm:$0xff]  }
  0x45   :  { %658 = vmatprep.mubr.bf16.mxu0 %v1131_v42  ;;  %594 = vmatprep.mubr.bf16.mxu1 %v1134_v43  ;;  %v552_v19 = vsel %vm517_vm0, %v1158_v17, 0  ;;  %v1170_v23 = vld [vmem:[%s1506_s0 + $0x88] ss:$28 sps:$4 sm:$0xff]   ;;  %v1171_v25 = vld [vmem:[%s1506_s0 + $0xc0] ss:$0 sps:$4 sm:$0x11]  }
  0x46   :  { %v1166_v24 = vld [vmem:[%s1506_s0 + $0x48] ss:$28 sps:$4 sm:$0xff]   ;;  %v42_v27 = vld [vmem:[%s1506_s0 + $0xb8] sm:$0x11] }
  0x47   :  { %v1167_v26 = vld [vmem:[%s1506_s0 + $0x84] ss:$28 sps:$4 sm:$0xff]   ;;  %v929_v29 = vcombine.high %v42_v27, %v42_v27  ;;  %v928_v30 = vcombine.low %v42_v27, %v42_v27 }
  0x48   :  { %v1169_v28 = vld [vmem:[%s1506_s0 + $0x80] ss:$28 sps:$4 sm:$0xff]  }
  0x4a   :  { %659 = vmatmul.mubr.bf16.gmra.mrb[4].mxu0 %v1133_v44  ;;  %595 = vmatmul.mubr.bf16.gmra.mrb[4].mxu1 %v1136_v45 }
  0x4b   :  { %685 = vmatpush1.bf16.xpose.msra.mxu0 %v1115_v46  ;;  %1007 = vmatpush3.bf16.xpose.msra.mxu1 %v534_v47 }
  0x4c   :  { %686 = vmatprep.subr.bf16.mxu0 %v1121_v48  ;;  %1048 = vmatprep.subr.msk.bf16.mxu1 %vm517_vm0, %v1122_v49 }
  0x4d   :  { %666 = vmatprep.mubr.bf16.mxu0 %v1141_v50  ;;  %602 = vmatprep.mubr.bf16.mxu1 %v1144_v51 }
  0x52   :  { %667 = vmatmul.mubr.bf16.gmra.mrb[8].mxu0 %v1143_v52  ;;  %603 = vmatmul.mubr.bf16.gmra.mrb[8].mxu1 %v1146_v53 }
  0x53   :  { %687 = vmatpush1.bf16.xpose.msra.mxu0 %v1119_v56  ;;  %1009 = vmatpush3.bf16.xpose.msra.mxu1 %v537_v57 }
  0x54   :  { %688 = vmatprep.subr.bf16.mxu0 %v1125_v58  ;;  %1049 = vmatprep.subr.msk.bf16.mxu1 %vm517_vm0, %v1126_v59 }
  0x55   :  { %674 = vmatprep.mubr.bf16.mxu0 %v927_v60  ;;  %610 = vmatprep.mubr.bf16.mxu1 %v925_v61 }
  0x5a   :  { %675 = vmatmul.mubr.bf16.gmra.mrb[12].mxu0 %v926_v62  ;;  %611 = vmatmul.mubr.bf16.gmra.mrb[12].mxu1 %v924_v63 }
  0x5b   :  { %689 = vmatpush1.bf16.xpose.msra.mxu0 %v1123_v0  ;;  %1011 = vmatpush3.bf16.xpose.msra.mxu1 %v540_v1 }
  0x5c   :  { %690 = vmatprep.subr.bf16.mxu0 %v1129_v2  ;;  %1050 = vmatprep.subr.msk.bf16.mxu1 %vm517_vm0, %v1130_v3 }
  0x5d   :  { %714 = vmatprep.mubr.bf16.mxu0 %v1161_v4  ;;  %1020 = vmatprep.mubr.msk.bf16.mxu1 %vm517_vm0, %v1162_v5 }
  0x63   :  { %691 = vmatpush1.bf16.xpose.msra.mxu0 %v1127_v6  ;;  %1013 = vmatpush3.bf16.xpose.msra.mxu1 %v543_v7 }
  0x64   :  { %692 = vmatprep.subr.bf16.mxu0 %v1139_v8  ;;  %1051 = vmatprep.subr.msk.bf16.mxu1 %vm517_vm0, %v1140_v9 }
  0x6b   :  { %693 = vmatpush1.bf16.xpose.msra.mxu0 %v1137_v10  ;;  %1015 = vmatpush3.bf16.xpose.msra.mxu1 %v546_v11 }
  0x6c   :  { %694 = vmatprep.subr.bf16.mxu0 %v1149_v12  ;;  %1052 = vmatprep.subr.msk.bf16.mxu1 %vm517_vm0, %v1150_v13 }
  0x73   :  { %695 = vmatpush1.bf16.xpose.msra.mxu0 %v1147_v14  ;;  %1017 = vmatpush3.bf16.xpose.msra.mxu1 %v549_v15 }
  0x74   :  { %696 = vmatprep.subr.bf16.mxu0 %v1157_v16  ;;  %1053 = vmatprep.subr.msk.bf16.mxu1 %vm517_vm0, %v1158_v17 }
  0x7b   :  { %697 = vmatpush1.bf16.xpose.msra.mxu0 %v1155_v18  ;;  %1019 = vmatpush3.bf16.xpose.msra.mxu1 %v552_v19 }
  0x82   :  { %715 = vmatmul.mubr.bf16.vlgmr.msra.gmra.mrb[0].mxu0 %v1159_v20  ;;  %1021 = vmatmul.mubr.msk.bf16.vlgmr.msra.gmra.mrb[16].mxu1 %vm517_vm0, %v1163_v21 }
  0x83   :  { %722 = vmatprep.mubr.bf16.mxu0 %v1164_v22  ;;  %1024 = vmatprep.mubr.msk.bf16.mxu1 %vm517_vm0, %v1170_v23 }
  0x8a   :  { %723 = vmatmul.mubr.bf16.gmra.mrb[4].mxu0 %v1166_v24  ;;  %1025 = vmatmul.mubr.msk.bf16.gmra.mrb[20].mxu1 %vm517_vm0, %v1171_v25 }
  0x8b   :  { %730 = vmatprep.mubr.bf16.mxu0 %v1167_v26 }
  0x92   :  { %731 = vmatmul.mubr.bf16.gmra.mrb[8].mxu0 %v1169_v28 }
  0x93   :  { %738 = vmatprep.mubr.bf16.mxu0 %v929_v29 }
  0x9a   :  { %739 = vmatmul.mubr.bf16.gmra.mrb[16].mxu0 %v928_v30 }
 0x115   :  { %v588_v31 = vpop.f32.mrb[0].mxu1 }
 0x116   :  { %v590_v32 = vpop.f32.mrb[1].mxu1 }
 0x117   :  { %v591_v33 = vpop.f32.mrb[2].mxu1 }
 0x118   :  { %v593_v34 = vpop.f32.mrb[3].mxu1 }
 0x11d   :  { %v596_v35 = vpop.f32.mrb[4].mxu1 }
 0x11e   :  { %v598_v36 = vpop.f32.mrb[5].mxu1 }
 0x11f   :  { %v599_v37 = vpop.f32.mrb[6].mxu1 }
 0x120   :  { %v601_v38 = vpop.f32.mrb[7].mxu1 }
 0x125   :  { %v604_v39 = vpop.f32.mrb[8].mxu1 }
 0x126   :  { %v606_v40 = vpop.f32.mrb[9].mxu1 }
 0x127   :  { %v607_v41 = vpop.f32.mrb[10].mxu1 }
 0x128   :  { %v609_v42 = vpop.f32.mrb[11].mxu1 }
 0x12d   :  { %v676_v43 = vpop.f32.mrb[12].mxu0  ;;  %v612_v44 = vpop.f32.mrb[12].mxu1 }
 0x12e   :  { %v678_v45 = vpop.f32.mrb[13].mxu0  ;;  %v677_v46 = vadd.f32 %v676_v43, %v612_v44  ;;  %v614_v47 = vpop.f32.mrb[13].mxu1 }
 0x12f   :  { %v679_v48 = vpop.f32.mrb[14].mxu0  ;;  %v615_v49 = vpop.f32.mrb[14].mxu1 }
 0x130   :  { %v680_v50 = vpop.f32.mrb[15].mxu0  ;;  %v616_v51 = vpop.f32.mrb[15].mxu1 }
 0x155   :  { %v716_v52 = vpop.f32.mrb[0].mxu0  ;;  %v1022_v53 = vpop.f32.mrb[16].mxu1 }
 0x156   :  { %v1028_v54 = vadd.f32 %v716_v52, %v588_v31  ;;  %v718_v55 = vpop.f32.mrb[1].mxu0  ;;  %v780_v56 = vpop.f32.mrb[17].mxu1 }
 0x157   :  { %v719_v57 = vpop.f32.mrb[2].mxu0  ;;  %v1023_v58 = vpop.f32.mrb[18].mxu1 }
 0x158   :  { %v1029_v59 = vadd.f32 %v719_v57, %v591_v33  ;;  %v781_v60 = vadd.f32 %v1028_v54, %v780_v56  ;;  %v721_v61 = vpop.f32.mrb[3].mxu0  ;;  %v783_v62 = vpop.f32.mrb[19].mxu1 }
 0x15a   :  { %v784_v63 = vadd.f32 %v1029_v59, %v783_v62 }
 0x15c   :  { %v810_v0 = vadd.f32 %v784_v63, %v781_v60 }
 0x15d   :  { %v724_v1 = vpop.f32.mrb[4].mxu0  ;;  %v1026_v2 = vpop.f32.mrb[20].mxu1 }
 0x15e   :  { %v1030_v3 = vadd.f32 %v724_v1, %v596_v35  ;;  %v726_v4 = vpop.f32.mrb[5].mxu0  ;;  %v796_v5 = vpop.f32.mrb[21].mxu1 }
 0x15f   :  { %v727_v6 = vpop.f32.mrb[6].mxu0  ;;  %v1027_v7 = vpop.f32.mrb[22].mxu1 }
 0x160   :  { %v789_v8 = vadd.f32 %v1030_v3, %v1022_v53  ;;  %v1031_v9 = vadd.f32 %v727_v6, %v599_v37  ;;  %v729_v10 = vpop.f32.mrb[7].mxu0  ;;  %v799_v11 = vpop.f32.mrb[23].mxu1  ;;  %v853_v7 = vld [vmem:[%s1508_s2] sm:$0x1] }
 0x162   :  { %v811_v12 = vadd.f32 %v810_v0, %v789_v8  ;;  %v792_v13 = vadd.f32 %v1031_v9, %v1023_v58 }
 0x164   :  { %v812_v14 = vadd.f32 %v811_v12, %v792_v13  ;;  %v991_v12 = vld [vmem:[%s1508_s2 + $0x1] ss:$0 sm:$0xff]  ;;  %s1176_s2 = scalar_lea.vmem %s893_s15, 896 }
 0x165   :  { %v732_v15 = vpop.f32.mrb[8].mxu0  ;;  %p1177_p0 = scmp.ne.s32.totalorder %s893_s15, %s1176_s2  ;;  %p1182_p2 = scmp.lt.s32.totalorder %s1176_s2, %s1176_s2 }
 0x166   :  { %v1032_v16 = vadd.f32 %v732_v15, %v604_v39  ;;  %v734_v17 = vpop.f32.mrb[9].mxu0 }
 0x167   :  { %v735_v18 = vpop.f32.mrb[10].mxu0  ;;  %p1183_p3 = por %p1182_p2, %p1181_p1 }
 0x168   :  { %v1033_v19 = vadd.f32 %v735_v18, %v607_v41  ;;  %v797_v20 = vadd.f32 %v1032_v16, %v796_v5  ;;  %v737_v21 = vpop.f32.mrb[11].mxu0  ;;  %v858_v5 = vlaneseq }
 0x169   :  { %p1184_p4 = pnand %p1183_p3, %p1177_p0 }
 0x16a   :  { %v813_v22 = vadd.f32 %v812_v14, %v797_v20  ;;  %v800_v23 = vadd.f32 %v1033_v19, %v799_v11  ;;  %v859_v6 = vshrl.u32 %v858_v5, 7 }
 0x16c   :  { %v814_v24 = vadd.f32 %v813_v22, %v800_v23 }
 0x16d   :  { %v740_v25 = vpop.f32.mrb[16].mxu0 }
 0x16e   :  { %v741_v26 = vadd.f32 %v740_v25, %v677_v46  ;;  %v742_v27 = vpop.f32.mrb[17].mxu0 }
 0x16f   :  { %v743_v28 = vpop.f32.mrb[18].mxu0 }
 0x170   :  { %v805_v29 = vadd.f32 %v1026_v2, %v741_v26  ;;  %v744_v30 = vpop.f32.mrb[19].mxu0 }
 0x172   :  { %v816_v31 = vsel %vm815_vm1, %v805_v29, 0.0 }
 0x173   :  { %v817_v32 = vadd.f32 %v816_v31, %v814_v24 }
 0x175   :  { %v818_v33 = vrot.slane %v817_v32, 4 }
 0x177   :  { %v819_v34 = vadd.f32 %v818_v33, %v817_v32 }
 0x179   :  { %v820_v35 = vrot.slane %v819_v34, 2 }
 0x17b   :  { %v821_v36 = vadd.f32 %v820_v35, %v819_v34 }
 0x17d   :  { %v822_v37 = vrot.slane %v821_v36, 1 }
 0x17f   :  { %v823_v38 = vadd.f32 %v822_v37, %v821_v36 }
 0x181   :  { %v824_v39 = vmul.f32 0.020408163, %v823_v38 }
 0x183   :  { %v825_v40 = vsub.f32 %v781_v60, %v824_v39  ;;  %v826_v41 = vsub.f32 %v784_v63, %v824_v39  ;;  %v827_v42 = vsub.f32 %v789_v8, %v824_v39  ;;  %v828_v43 = vsub.f32 %v792_v13, %v824_v39 }
 0x184   :  { %v829_v44 = vsub.f32 %v797_v20, %v824_v39  ;;  %v830_v45 = vsub.f32 %v800_v23, %v824_v39  ;;  %v831_v46 = vsub.f32 %v805_v29, %v824_v39  ;;  %v860_v8 = vsub.s32 0, %v859_v6 }
 0x185   :  { %v832_v47 = vmul.f32 %v825_v40, %v825_v40  ;;  %v833_v48 = vmul.f32 %v826_v41, %v826_v41  ;;  %v834_v49 = vmul.f32 %v827_v42, %v827_v42  ;;  %v835_v51 = vmul.f32 %v828_v43, %v828_v43 }
 0x186   :  { %v836_v53 = vmul.f32 %v829_v44, %v829_v44  ;;  %v838_v55 = vmul.f32 %v831_v46, %v831_v46  ;;  %v837_v56 = vmul.f32 %v830_v45, %v830_v45 }
 0x187   :  { %v839_v50 = vadd.f32 %v833_v48, %v832_v47 }
 0x188   :  { %v844_v59 = vsel %vm815_vm1, %v838_v55, 0.0 }
 0x189   :  { %v840_v52 = vadd.f32 %v839_v50, %v834_v49 }
 0x18b   :  { %v841_v54 = vadd.f32 %v840_v52, %v835_v51 }
 0x18d   :  { %v842_v57 = vadd.f32 %v841_v54, %v836_v53 }
 0x18f   :  { %v843_v58 = vadd.f32 %v842_v57, %v837_v56 }
 0x191   :  { %v845_v60 = vadd.f32 %v844_v59, %v843_v58 }
 0x193   :  { %v846_v61 = vrot.slane %v845_v60, 4 }
 0x195   :  { %v847_v62 = vadd.f32 %v846_v61, %v845_v60 }
 0x197   :  { %v848_v63 = vrot.slane %v847_v62, 2 }
 0x199   :  { %v849_v0 = vadd.f32 %v848_v63, %v847_v62 }
 0x19b   :  { %v850_v1 = vrot.slane %v849_v0, 1 }
 0x19d   :  { %v851_v2 = vadd.f32 %v850_v1, %v849_v0 }
 0x19f   :  { %v852_v3 = vmul.f32 0.020408163, %v851_v2 }
 0x1a1   :  { %v855_v4 = vadd.f32 0.001, %v852_v3 }
 0x1a3   :  { %1174 = vrsqrt.f32 %v855_v4 }
 0x1ad   :  { %v1175_v9 = vpop.eup %1174 }
 0x1ae   :  { %v857_v10 = vmul.f32 %v1175_v9, %v853_v7 }
 0x1b0   :  { %v861_v11 = vrot.slane %v857_v10, %v860_v8 }
 0x1b2   :  { %v862_v13 = vmul.f32 %v861_v11, %v825_v40  ;;  %v863_v14 = vmul.f32 %v861_v11, %v826_v41  ;;  %v864_v15 = vmul.f32 %v861_v11, %v827_v42  ;;  %v865_v16 = vmul.f32 %v861_v11, %v828_v43 }
 0x1b3   :  { %v866_v17 = vmul.f32 %v861_v11, %v829_v44  ;;  %v867_v18 = vmul.f32 %v861_v11, %v830_v45  ;;  %v868_v19 = vmul.f32 %v861_v11, %v831_v46 }
 0x1b4   :  { %v873_v20 = vadd.f32 %v991_v12, %v862_v13  ;;  %v874_v21 = vadd.f32 %v991_v12, %v863_v14  ;;  %v875_v22 = vadd.f32 %v991_v12, %v864_v15  ;;  %v876_v23 = vadd.f32 %v991_v12, %v865_v16 }
 0x1b5   :  { %v877_v24 = vadd.f32 %v991_v12, %v866_v17  ;;  %v878_v25 = vadd.f32 %v991_v12, %v867_v18  ;;  %v879_v26 = vadd.f32 %v991_v12, %v868_v19 }
 0x1b6   :  { %880 = vst [vmem:[#allocation2] sm:$0xff] %v873_v20  ;;  %881 = vst [vmem:[#allocation2 + $0x8] sm:$0xff] %v874_v21 }
 0x1b7   :  { %882 = vst [vmem:[#allocation2 + $0x10] sm:$0xff] %v875_v22  ;;  %883 = vst [vmem:[#allocation2 + $0x18] sm:$0xff] %v876_v23 }
 0x1b8   :  { %884 = vst [vmem:[#allocation2 + $0x20] sm:$0xff] %v877_v24  ;;  %885 = vst [vmem:[#allocation2 + $0x28] sm:$0xff] %v878_v25 }
 0x1b9   :  { %886 = vst [vmem:[#allocation2 + $0x30] sm:$0x1] %v879_v26 }
 0x1ba   :  { %1187 = shalt.err (!%p1184_p4)
}
 0x1bb   :  { %s1188_s18 = scalar_lea.hbm %s1509_s3, 896 }
 0x1bc   :  { %p1189_p5 = scmp.ne.s32.totalorder %s1509_s3, %s1188_s18  ;;  %p1192_p6 = scmp.lt.u32.totalorder %s1188_s18, %s1509_s3 }
 0x1be   :  { %p1194_p7 = pnand %p1192_p6, %p1189_p5 }
 0x1c0   :  { %1197 = shalt.err (!%p1194_p7)
}
 0x1c1   :  { %s1201_s23 = smov 128   ;;  %s1202_s24 = smov 8  }
 0x1c2   :  { %898 = dma.vmem_to_hbm [thread:$0]  %s893_s15, 896, %s1509_s3, [#allocation3], %s1201_s23, %s1201_s23, %s1202_s24  }
 0x1c3   :  { %1198 = dma.done.wait [#allocation3], 896  }
 0x1c4   :  { %1199 = vsyncadd [#allocation3], 4294966400 }
 0x1c5   :  { %902 = vsyncpa [#allocation3], 1 }

</bundles_post_ra>
